<compile_context>
chip_gen: v7x
topology: tpu7x:2x2x1
jax: 0.10.0
libtpu: 0.0.40
codegen_flags: <defaults>
</compile_context>

<pallas_src>
import functools
import math

import jax
import jax.numpy as jnp
from jax.experimental import pallas as pl
from jax.experimental.pallas import tpu as pltpu

STD_DEV = 0.1  # module's __init__ hyperparameter

_LANES = 128
_ROW_ALIGN = 16       # keeps each half-tile (8,128)-aligned for f32
_MAX_TILE_ROWS = 4096  # (4096, 128) f32 = 2 MiB per pipeline buffer


def _round_up(a, b):
    return ((a + b - 1) // b) * b


def _pick_tile_rows(rows):
    """Largest multiple of _ROW_ALIGN that divides `rows`, capped at
    _MAX_TILE_ROWS, and (when the tensor allows it) small enough that the grid
    has >= 2 steps so v7x's two TensorCores both get work.

    `rows` is always a multiple of _ROW_ALIGN.  Pathological sizes
    (16 * large-prime rows) fall back to small tiles — correct, just
    overhead-bound; conv activations are essentially never shaped that way.
    """
    upper = min(_MAX_TILE_ROWS, rows)
    if rows >= 2 * _ROW_ALIGN:
        upper = min(upper, _round_up(rows // 2, _ROW_ALIGN))
    best = _ROW_ALIGN
    for cand in range(_ROW_ALIGN, upper + 1, _ROW_ALIGN):
        if rows % cand == 0:
            best = cand
    return best


def _mix32(x):
    """lowbias32-style finalizer: uint32 -> uint32 with good avalanche."""
    x = x ^ (x >> 16)
    x = x * jnp.uint32(0x7FEB352D)
    x = x ^ (x >> 15)
    x = x * jnp.uint32(0x846CA68B)
    x = x ^ (x >> 16)
    return x


def _uniform_1_2(bits):
    """uint32 bits -> f32 uniform in [1, 2): mantissa bit-trick, no converts."""
    mant = (bits >> 9) | jnp.uint32(0x3F800000)
    return pltpu.bitcast(mant, jnp.float32)


def _add_gaussian_noise_kernel(seed_ref, base_ref, x_ref, o_ref, *, std_dev, half):
    # --- per-tile scalar key (scalar-unit work, negligible) -----------------
    seed = seed_ref[0].astype(jnp.uint32)
    pid = pl.program_id(0).astype(jnp.uint32)
    key1 = _mix32(_mix32(seed ^ jnp.uint32(0x9E3779B9)) + pid * jnp.uint32(0x9E3779B9))
    key2 = _mix32(key1 ^ jnp.uint32(0x85EBCA6B))

    # --- per-element counter hash (base is precomputed, resident in VMEM) ---
    base = base_ref[...]                      # (half, 128) uint32, 0 .. half*128-1
    bits1 = _mix32(base + key1)
    bits2 = _mix32(bits1 ^ key2)              # derived stream: no 2nd counter mul

    u1 = 2.0 - _uniform_1_2(bits1)            # (0, 1]  -> log-safe
    u2 = _uniform_1_2(bits2) - 1.0            # [0, 1)

    # --- Box-Muller, both outputs, single trig polynomial -------------------
    r = jnp.sqrt(-2.0 * jnp.log(u1))
    c = jnp.cos((2.0 * math.pi) * u2)
    s = jnp.sqrt(jnp.maximum(1.0 - c * c, 0.0))
    s = jnp.where(u2 < 0.5, s, -s)            # sign(sin(2*pi*u2)), exact

    # --- split half stores: no concat, chain stays in vregs -----------------
    std = jnp.float32(std_dev)
    o_ref[:half, :] = (x_ref[:half, :].astype(jnp.float32) + std * (r * c)).astype(o_ref.dtype)
    o_ref[half:, :] = (x_ref[half:, :].astype(jnp.float32) + std * (r * s)).astype(o_ref.dtype)


def add_gaussian_noise(x, seed, std_dev=STD_DEV):
    """x: any-shape float array (e.g. NCHW). seed: python int / int32 scalar."""
    orig_shape = x.shape
    orig_dtype = x.dtype

    flat = x.reshape(-1)
    n = flat.shape[0]

    rows = _round_up(pl.cdiv(n, _LANES), _ROW_ALIGN)
    n_pad = rows * _LANES
    if n_pad != n:
        # TODO(synk): mask the last tile's store against the true length instead
        # of pad+slice (extra HBM pass); conv activations are normally already a
        # multiple of 2048 elements, so this branch is rarely taken.
        flat = jnp.pad(flat, (0, n_pad - n))

    tile_rows = _pick_tile_rows(rows)
    half = tile_rows // 2
    grid = (rows // tile_rows,)

    x2d = flat.reshape(rows, _LANES)
    seed_arr = jnp.asarray([seed], dtype=jnp.int32)
    # Hoisted per-tile linear-index base: constant index_map -> copied once per
    # core, then resident; saves iota/shift/add VALU work in a VALU-bound kernel.
    base = jnp.arange(half * _LANES, dtype=jnp.uint32).reshape(half, _LANES)

    kernel = functools.partial(
        _add_gaussian_noise_kernel, std_dev=float(std_dev), half=half
    )

    itemsize = jnp.dtype(orig_dtype).itemsize
    cost = pl.CostEstimate(
        flops=30 * n_pad,                    # hash + Box-Muller arithmetic
        transcendentals=2 * n_pad,           # log/sqrt/cos/sqrt per element pair
        bytes_accessed=2 * n_pad * itemsize + base.size * 4,
    )

    out2d = pl.pallas_call(
        kernel,
        out_shape=jax.ShapeDtypeStruct((rows, _LANES), orig_dtype),
        grid=grid,
        in_specs=[
            pl.BlockSpec(memory_space=pltpu.MemorySpace.SMEM),     # seed scalar
            pl.BlockSpec((half, _LANES), lambda i: (0, 0)),        # index base (resident)
            pl.BlockSpec((tile_rows, _LANES), lambda i: (i, 0)),   # x tile
        ],
        out_specs=pl.BlockSpec((tile_rows, _LANES), lambda i: (i, 0)),
        input_output_aliases={2: 0},  # reuse x's buffer when donated & unpadded
        compiler_params=pltpu.CompilerParams(
            dimension_semantics=("parallel",),      # v7x: shard row-grid over 2 TCs
            vmem_limit_bytes=32 * 1024 * 1024,      # covers 2 MiB buffers on v5e too
        ),
        cost_estimate=cost,
    )(seed_arr, base, x2d)

    out = out2d.reshape(-1)
    if n_pad != n:
        out = out[:n]
    return out.reshape(orig_shape)


if __name__ == "__main__":
    key = jax.random.PRNGKey(0)
    k_x, k_seed = jax.random.split(key)

    # Small NCHW input consistent with a conv-net activation.
    x = jax.random.normal(k_x, (2, 4, 16, 16), dtype=jnp.float32)
    seed = int(jax.random.randint(k_seed, (), 0, 2**31 - 1))

    y = jax.block_until_ready(add_gaussian_noise(x, seed, std_dev=STD_DEV))

    # Sanity checks: shape/dtype preserved, added noise has roughly the right scale.
    assert y.shape == x.shape and y.dtype == x.dtype
    noise = y - x
    assert float(jnp.abs(jnp.mean(noise))) < 0.05
    assert 0.03 < float(jnp.std(noise)) < 0.3

    print("KERNEL_OK")
</pallas_src>

<mosaic_0001>
module attributes {stable_mosaic.version = 11 : i64} {
  func.func @_add_gaussian_noise_kernel(%arg0: i32, %arg1: memref<1xi32, #tpu.memory_space<smem>>, %arg2: memref<8x128xi32, #tpu.memory_space<vmem>>, %arg3: memref<16x128xf32, #tpu.memory_space<vmem>>, %arg4: memref<16x128xf32, #tpu.memory_space<vmem>>) attributes {dimension_semantics = [#tpu.dimension_semantics<parallel>], iteration_bounds = array<i64: 1>, scalar_prefetch = 0 : i64, scratch_operands = 0 : i64, tpu.core_type = #tpu.core_type<tc>, window_params = [{transform_indices = @transform_0, window_bounds = array<i64: 1>}, {pipeline_mode = #tpu.pipeline_mode<synchronous>, transform_indices = @transform_1, window_bounds = array<i64: 8, 128>}, {transform_indices = @transform_2, window_bounds = array<i64: 16, 128>}, {transform_indices = @transform_3, window_bounds = array<i64: 16, 128>}]} {
    %c0 = arith.constant 0 : index
    %0 = memref.load %arg1[%c0] : memref<1xi32, #tpu.memory_space<smem>>
    %c-1640531527_i32 = arith.constant -1640531527 : i32
    %1 = arith.xori %0, %c-1640531527_i32 : i32
    %c16_i32 = arith.constant 16 : i32
    %2 = arith.shrui %1, %c16_i32 : i32
    %3 = arith.xori %1, %2 : i32
    %c2146121005_i32 = arith.constant 2146121005 : i32
    %4 = arith.muli %3, %c2146121005_i32 : i32
    %c15_i32 = arith.constant 15 : i32
    %5 = arith.shrui %4, %c15_i32 : i32
    %6 = arith.xori %4, %5 : i32
    %c-2073254261_i32 = arith.constant -2073254261 : i32
    %7 = arith.muli %6, %c-2073254261_i32 : i32
    %c16_i32_0 = arith.constant 16 : i32
    %8 = arith.shrui %7, %c16_i32_0 : i32
    %9 = arith.xori %7, %8 : i32
    %c-1640531527_i32_1 = arith.constant -1640531527 : i32
    %10 = arith.muli %arg0, %c-1640531527_i32_1 : i32
    %11 = arith.addi %9, %10 : i32
    %c16_i32_2 = arith.constant 16 : i32
    %12 = arith.shrui %11, %c16_i32_2 : i32
    %13 = arith.xori %11, %12 : i32
    %c2146121005_i32_3 = arith.constant 2146121005 : i32
    %14 = arith.muli %13, %c2146121005_i32_3 : i32
    %c15_i32_4 = arith.constant 15 : i32
    %15 = arith.shrui %14, %c15_i32_4 : i32
    %16 = arith.xori %14, %15 : i32
    %c-2073254261_i32_5 = arith.constant -2073254261 : i32
    %17 = arith.muli %16, %c-2073254261_i32_5 : i32
    %c16_i32_6 = arith.constant 16 : i32
    %18 = arith.shrui %17, %c16_i32_6 : i32
    %19 = arith.xori %17, %18 : i32
    %c-2048144789_i32 = arith.constant -2048144789 : i32
    %20 = arith.xori %19, %c-2048144789_i32 : i32
    %c16_i32_7 = arith.constant 16 : i32
    %21 = arith.shrui %20, %c16_i32_7 : i32
    %22 = arith.xori %20, %21 : i32
    %c2146121005_i32_8 = arith.constant 2146121005 : i32
    %23 = arith.muli %22, %c2146121005_i32_8 : i32
    %c15_i32_9 = arith.constant 15 : i32
    %24 = arith.shrui %23, %c15_i32_9 : i32
    %25 = arith.xori %23, %24 : i32
    %c-2073254261_i32_10 = arith.constant -2073254261 : i32
    %26 = arith.muli %25, %c-2073254261_i32_10 : i32
    %c16_i32_11 = arith.constant 16 : i32
    %27 = arith.shrui %26, %c16_i32_11 : i32
    %28 = arith.xori %26, %27 : i32
    %c0_12 = arith.constant 0 : index
    %c0_13 = arith.constant 0 : index
    %29 = vector.load %arg2[%c0_12, %c0_13] : memref<8x128xi32, #tpu.memory_space<vmem>>, vector<8x128xi32>
    %30 = vector.broadcast %19 : i32 to vector<8x128xi32>
    %31 = arith.addi %29, %30 : vector<8x128xi32>
    %c16_i32_14 = arith.constant 16 : i32
    %32 = vector.broadcast %c16_i32_14 : i32 to vector<8x128xi32>
    %33 = arith.shrui %31, %32 : vector<8x128xi32>
    %34 = arith.xori %31, %33 : vector<8x128xi32>
    %c2146121005_i32_15 = arith.constant 2146121005 : i32
    %35 = vector.broadcast %c2146121005_i32_15 : i32 to vector<8x128xi32>
    %36 = arith.muli %34, %35 : vector<8x128xi32>
    %c15_i32_16 = arith.constant 15 : i32
    %37 = vector.broadcast %c15_i32_16 : i32 to vector<8x128xi32>
    %38 = arith.shrui %36, %37 : vector<8x128xi32>
    %39 = arith.xori %36, %38 : vector<8x128xi32>
    %c-2073254261_i32_17 = arith.constant -2073254261 : i32
    %40 = vector.broadcast %c-2073254261_i32_17 : i32 to vector<8x128xi32>
    %41 = arith.muli %39, %40 : vector<8x128xi32>
    %c16_i32_18 = arith.constant 16 : i32
    %42 = vector.broadcast %c16_i32_18 : i32 to vector<8x128xi32>
    %43 = arith.shrui %41, %42 : vector<8x128xi32>
    %44 = arith.xori %41, %43 : vector<8x128xi32>
    %45 = vector.broadcast %28 : i32 to vector<8x128xi32>
    %46 = arith.xori %44, %45 : vector<8x128xi32>
    %c16_i32_19 = arith.constant 16 : i32
    %47 = vector.broadcast %c16_i32_19 : i32 to vector<8x128xi32>
    %48 = arith.shrui %46, %47 : vector<8x128xi32>
    %49 = arith.xori %46, %48 : vector<8x128xi32>
    %c2146121005_i32_20 = arith.constant 2146121005 : i32
    %50 = vector.broadcast %c2146121005_i32_20 : i32 to vector<8x128xi32>
    %51 = arith.muli %49, %50 : vector<8x128xi32>
    %c15_i32_21 = arith.constant 15 : i32
    %52 = vector.broadcast %c15_i32_21 : i32 to vector<8x128xi32>
    %53 = arith.shrui %51, %52 : vector<8x128xi32>
    %54 = arith.xori %51, %53 : vector<8x128xi32>
    %c-2073254261_i32_22 = arith.constant -2073254261 : i32
    %55 = vector.broadcast %c-2073254261_i32_22 : i32 to vector<8x128xi32>
    %56 = arith.muli %54, %55 : vector<8x128xi32>
    %c16_i32_23 = arith.constant 16 : i32
    %57 = vector.broadcast %c16_i32_23 : i32 to vector<8x128xi32>
    %58 = arith.shrui %56, %57 : vector<8x128xi32>
    %59 = arith.xori %56, %58 : vector<8x128xi32>
    %c9_i32 = arith.constant 9 : i32
    %60 = vector.broadcast %c9_i32 : i32 to vector<8x128xi32>
    %61 = arith.shrui %44, %60 : vector<8x128xi32>
    %c1065353216_i32 = arith.constant 1065353216 : i32
    %62 = vector.broadcast %c1065353216_i32 : i32 to vector<8x128xi32>
    %63 = arith.ori %61, %62 : vector<8x128xi32>
    %64 = tpu.bitcast %63 : vector<8x128xi32> -> vector<8x128xf32>
    %cst = arith.constant 2.000000e+00 : f32
    %65 = vector.broadcast %cst : f32 to vector<8x128xf32>
    %66 = arith.subf %65, %64 : vector<8x128xf32>
    %c9_i32_24 = arith.constant 9 : i32
    %67 = vector.broadcast %c9_i32_24 : i32 to vector<8x128xi32>
    %68 = arith.shrui %59, %67 : vector<8x128xi32>
    %c1065353216_i32_25 = arith.constant 1065353216 : i32
    %69 = vector.broadcast %c1065353216_i32_25 : i32 to vector<8x128xi32>
    %70 = arith.ori %68, %69 : vector<8x128xi32>
    %71 = tpu.bitcast %70 : vector<8x128xi32> -> vector<8x128xf32>
    %cst_26 = arith.constant 1.000000e+00 : f32
    %72 = vector.broadcast %cst_26 : f32 to vector<8x128xf32>
    %73 = arith.subf %71, %72 : vector<8x128xf32>
    %74 = math.log %66 : vector<8x128xf32>
    %cst_27 = arith.constant -2.000000e+00 : f32
    %75 = vector.broadcast %cst_27 : f32 to vector<8x128xf32>
    %76 = arith.mulf %75, %74 : vector<8x128xf32>
    %77 = math.sqrt %76 : vector<8x128xf32>
    %cst_28 = arith.constant 6.28318548 : f32
    %78 = vector.broadcast %cst_28 : f32 to vector<8x128xf32>
    %79 = arith.mulf %78, %73 : vector<8x128xf32>
    %80 = math.cos %79 : vector<8x128xf32>
    %81 = arith.mulf %80, %80 : vector<8x128xf32>
    %cst_29 = arith.constant 1.000000e+00 : f32
    %82 = vector.broadcast %cst_29 : f32 to vector<8x128xf32>
    %83 = arith.subf %82, %81 : vector<8x128xf32>
    %cst_30 = arith.constant 0.000000e+00 : f32
    %84 = vector.broadcast %cst_30 : f32 to vector<8x128xf32>
    %85 = arith.maximumf %83, %84 : vector<8x128xf32>
    %86 = math.sqrt %85 : vector<8x128xf32>
    %cst_31 = arith.constant 5.000000e-01 : f32
    %87 = vector.broadcast %cst_31 : f32 to vector<8x128xf32>
    %88 = arith.cmpf olt, %73, %87 : vector<8x128xf32>
    %cst_32 = arith.constant 0.000000e+00 : f32
    %89 = vector.broadcast %cst_32 : f32 to vector<8x128xf32>
    %90 = arith.subf %89, %86 : vector<8x128xf32>
    %91 = arith.select %88, %86, %90 : vector<8x128xi1>, vector<8x128xf32>
    %c0_33 = arith.constant 0 : index
    %c0_34 = arith.constant 0 : index
    %92 = vector.load %arg3[%c0_33, %c0_34] : memref<16x128xf32, #tpu.memory_space<vmem>>, vector<8x128xf32>
    %93 = arith.mulf %77, %80 : vector<8x128xf32>
    %cst_35 = arith.constant 1.000000e-01 : f32
    %94 = vector.broadcast %cst_35 : f32 to vector<8x128xf32>
    %95 = arith.mulf %94, %93 : vector<8x128xf32>
    %96 = arith.addf %92, %95 : vector<8x128xf32>
    %c0_36 = arith.constant 0 : index
    %c0_37 = arith.constant 0 : index
    %97 = vector.load %arg4[%c0_36, %c0_37] : memref<16x128xf32, #tpu.memory_space<vmem>>, vector<8x128xf32>
    tpu.vector_store %arg4[%c0_36, %c0_37], %96 {strides = array<i32>} : memref<16x128xf32, #tpu.memory_space<vmem>>, vector<8x128xf32>,
    %c8 = arith.constant 8 : index
    %c0_38 = arith.constant 0 : index
    %98 = vector.load %arg3[%c8, %c0_38] : memref<16x128xf32, #tpu.memory_space<vmem>>, vector<8x128xf32>
    %99 = arith.mulf %77, %91 : vector<8x128xf32>
    %cst_39 = arith.constant 1.000000e-01 : f32
    %100 = vector.broadcast %cst_39 : f32 to vector<8x128xf32>
    %101 = arith.mulf %100, %99 : vector<8x128xf32>
    %102 = arith.addf %98, %101 : vector<8x128xf32>
    %c8_40 = arith.constant 8 : index
    %c0_41 = arith.constant 0 : index
    %103 = vector.load %arg4[%c8_40, %c0_41] : memref<16x128xf32, #tpu.memory_space<vmem>>, vector<8x128xf32>
    tpu.vector_store %arg4[%c8_40, %c0_41], %102 {strides = array<i32>} : memref<16x128xf32, #tpu.memory_space<vmem>>, vector<8x128xf32>,
    return
  }
  func.func @transform_0(%arg0: i32) -> i32 {
    %c0_i32 = arith.constant 0 : i32
    %c0_i32_0 = arith.constant 0 : i32
    return %c0_i32 : i32
  }
  func.func @transform_1(%arg0: i32) -> (i32, i32) {
    %c0_i32 = arith.constant 0 : i32
    %c0_i32_0 = arith.constant 0 : i32
    %c0_i32_1 = arith.constant 0 : i32
    return %c0_i32, %c0_i32_0 : i32, i32
  }
  func.func @transform_2(%arg0: i32) -> (i32, i32) {
    %c0_i32 = arith.constant 0 : i32
    %c0_i32_0 = arith.constant 0 : i32
    return %arg0, %c0_i32 : i32, i32
  }
  func.func @transform_3(%arg0: i32) -> (i32, i32) {
    %c0_i32 = arith.constant 0 : i32
    %c0_i32_0 = arith.constant 0 : i32
    return %arg0, %c0_i32 : i32, i32
  }
}

</mosaic_0001>

<bundles_post_ra>
// kernel: tpu_custom_call.1
= control target key start
LH: loop header
LB: loop body
LE: loop exit
PB: predicated region body
PF: predicated region fallthrough
CT: control target
= control target key end

     0   :  { %9 = vsyncpa [#allocation4], 0  ;;  %s414_s0 = inlined_call_operand.<no memory space> [shape: s32[1], index: 0, kind: input, shape index: {}]   ;;  %s415_s1 = inlined_call_operand.vmem [shape: u32[8,128], index: 1, kind: input, shape index: {}]   ;;  %s416_s2 = inlined_call_operand.hbm [shape: f32[16,128], index: 2, kind: input, shape index: {}, may-alias: {2,3}]   ;;  %s417_s3 = inlined_call_operand.hbm [shape: f32[16,128], index: 3, kind: output, shape index: {}, may-alias: {2,3}]  }
   0x1   :  { %10 = vsyncpa [#allocation5], 0  ;;  %s319_s12 = smov [#allocation3]   ;;  %s271_s16 = scalar_lea.hbm %s416_s2, 256 }
   0x2   :  { %s20_s13 = sshll.u32 %s319_s12, 4  ;;  %p272_p0 = scmp.ne.s32.totalorder %s416_s2, %s271_s16  ;;  %s21_s13 = int_to_ptr.vmem [resolvable:$true] %s20_s13 }
   0x3   :  { %p275_p1 = scmp.lt.u32.totalorder %s271_s16, %s416_s2 }
   0x5   :  { %p277_p2 = pnand %p275_p1, %p272_p0 }
   0x7   :  { %280 = shalt.err (!%p277_p2)
}
   0x8   :  { %s281_s21 = scalar_lea.vmem %s21_s13, 256  ;;  %p286_p4 = scmp.lt.s32.totalorder %s21_s13, %s21_s13 }
   0x9   :  { %p282_p3 = scmp.ne.s32.totalorder %s21_s13, %s281_s21  ;;  %p287_p5 = scmp.lt.s32.totalorder %s281_s21, %s281_s21 }
   0xb   :  { %p288_p6 = por %p287_p5, %p286_p4 }
   0xd   :  { %p289_p7 = pnand %p288_p6, %p282_p3 }
   0xf   :  { %292 = shalt.err (!%p289_p7)
}
  0x10   :  { %s320_s22 = smov 128   ;;  %s321_s23 = smov 8  }
  0x11   :  { %26 = dma.hbm_to_vmem [thread:$0]  %s416_s2, 256, %s21_s13, [#allocation4], %s320_s22, %s320_s22, %s321_s23  }
  0x12   :  { %315 = dma.done.wait [#allocation4], 256  }
  0x13   :  { %316 = vsyncadd [#allocation4], 4294967040  ;;  %s31_s28 = sxor.u32 2654435769, %s414_s0  ;;  %v59_v0 = vld [vmem:[%s415_s1] sm:$0xff]  ;;  %s328_s1 = smov [#allocation6]  }
  0x14   :  { %s32_s29 = sshrl.u32 %s31_s28, 16  ;;  %v322_v36 = vmov 683565275   ;;  %v323_v38 = vmov 2475754826  }
  0x15   :  { %s33_s30 = sxor.u32 %s32_s29, %s31_s28  ;;  %v324_v40 = vmov 2131351028   ;;  %v325_v42 = vmov 2102212464   ;;  %v326_v44 = vmov 920167782  }
  0x16   :  { %s34_s4 = smul.u32 2146121005, %s33_s30  ;;  %v327_v51 = vmov 1326507024   ;;  %s230_s29 = sshll.u32 %s328_s1, 4  ;;  %s231_s29 = int_to_ptr.vmem [resolvable:$true] %s230_s29 }
  0x17   :  { %s293_s30 = scalar_lea.vmem %s231_s29, 256  ;;  %p298_p9 = scmp.lt.s32.totalorder %s231_s29, %s231_s29 }
  0x18   :  { %s35_s5 = sshrl.u32 %s34_s4, 15  ;;  %p294_p8 = scmp.ne.s32.totalorder %s231_s29, %s293_s30 }
  0x19   :  { %s36_s6 = sxor.u32 %s35_s5, %s34_s4  ;;  %p299_p10 = scmp.lt.s32.totalorder %s293_s30, %s293_s30 }
  0x1a   :  { %s37_s7 = smul.u32 2221713035, %s36_s6 }
  0x1b   :  { %p300_p11 = por %p299_p10, %p298_p9 }
  0x1c   :  { %s38_s8 = sshrl.u32 %s37_s7, 16 }
  0x1d   :  { %s39_s9 = sxor.u32 %s38_s8, %s37_s7  ;;  %p301_p12 = pnand %p300_p11, %p294_p8 }
  0x1e   :  { %s42_s10 = sshrl.u32 %s39_s9, 16 }
  0x1f   :  { %s43_s11 = sxor.u32 %s42_s10, %s39_s9 }
  0x20   :  { %s44_s12 = smul.u32 2146121005, %s43_s11 }
  0x22   :  { %s45_s14 = sshrl.u32 %s44_s12, 15 }
  0x23   :  { %s46_s15 = sxor.u32 %s45_s14, %s44_s12 }
  0x24   :  { %s47_s2 = smul.u32 2221713035, %s46_s15 }
  0x26   :  { %s48_s13 = sshrl.u32 %s47_s2, 16 }
  0x27   :  { %s49_s0 = sxor.u32 %s48_s13, %s47_s2 }
  0x28   :  { %s50_s18 = sxor.u32 2246822507, %s49_s0  ;;  %v60_v1 = vstv %s49_s0 }
  0x29   :  { %s51_s19 = sshrl.u32 %s50_s18, 16  ;;  %v61_v2 = vadd.s32 %v60_v1, %v59_v0 }
  0x2a   :  { %s52_s20 = sxor.u32 %s51_s19, %s50_s18 }
  0x2b   :  { %s53_s21 = smul.u32 2146121005, %s52_s20  ;;  %v62_v3 = vshrl.u32 %v61_v2, 16 }
  0x2d   :  { %s54_s24 = sshrl.u32 %s53_s21, 15  ;;  %v63_v4 = vxor.u32 %v62_v3, %v61_v2 }
  0x2e   :  { %s55_s25 = sxor.u32 %s54_s24, %s53_s21 }
  0x2f   :  { %s56_s26 = smul.u32 2221713035, %s55_s25  ;;  %v64_v5 = vmul.u32 2146121005, %v63_v4 }
  0x31   :  { %v65_v6 = vshrl.u32 %v64_v5, 15  ;;  %s57_s27 = sshrl.u32 %s56_s26, 16 }
  0x32   :  { %s58_s28 = sxor.u32 %s57_s27, %s56_s26 }
  0x33   :  { %v66_v7 = vxor.u32 %v65_v6, %v64_v5  ;;  %v70_v10 = vstv %s58_s28 }
  0x35   :  { %v67_v8 = vmul.u32 2221713035, %v66_v7 }
  0x37   :  { %v68_v9 = vshrl.u32 %v67_v8, 16 }
  0x39   :  { %v370_v11 = vxor.u32 %v68_v9, %v67_v8 }
  0x3b   :  { %v71_v12 = vxor.u32 %v70_v10, %v370_v11 }
  0x3d   :  { %v72_v13 = vshrl.u32 %v71_v12, 16 }
  0x3f   :  { %v73_v14 = vxor.u32 %v72_v13, %v71_v12  ;;  %v80_v13 = vshrl.u32 %v370_v11, 9 }
  0x41   :  { %v74_v15 = vmul.u32 2146121005, %v73_v14 }
  0x43   :  { %v75_v16 = vshrl.u32 %v74_v15, 15 }
  0x45   :  { %v76_v17 = vxor.u32 %v75_v16, %v74_v15 }
  0x47   :  { %v77_v18 = vmul.u32 2221713035, %v76_v17  ;;  %v81_v17 = vor.u32 1065353216, %v80_v13 }
  0x49   :  { %v78_v19 = vshrl.u32 %v77_v18, 16 }
  0x4b   :  { %v79_v20 = vxor.u32 %v78_v19, %v77_v18 }
  0x4d   :  { %v84_v21 = vshrl.u32 %v79_v20, 9  ;;  %v83_v20 = vsub.f32 2.0, %v81_v17 }
  0x4f   :  { %v85_v22 = vor.u32 1065353216, %v84_v21  ;;  %261 = vlog2.f32 %v83_v20 }
  0x51   :  { %v373_v23 = vadd.f32 -1.0, %v85_v22 }
  0x53   :  { %v376_v24 = vmul.f32 6.2831855, %v373_v23 }
  0x55   :  { %v102_v25 = vand.u32 2139095040, %v376_v24  ;;  %v99_v27 = vand.u32 2147483647, %v376_v24  ;;  %vm101_vm7 = vcmp.lt.s32.totalorder %v376_v24, 0  ;;  %vm191_vm14 = vweird.f32 %v376_v24 }
  0x57   :  { %v103_v26 = vshrl.u32 %v102_v25, 23  ;;  %v106_v30 = vand.u32 8388607, %v99_v27  ;;  %vm100_vm8 = vcmp.le.f32.partialorder %v99_v27, 0.7853982 }
  0x59   :  { %v243_v28 = vadd.s32 4294967169, %v103_v26  ;;  %v107_v33 = vor.u32 8388608, %v106_v30  ;;  %v262_v30 = vpop.eup %261 }
  0x5b   :  { %v109_v29 = vadd.s32 1, %v243_v28  ;;  %v147_v53 = vshll.u32 %v107_v33, 8 }
  0x5d   :  { %vm110_vm0 = vcmp.gt.s32.totalorder %v109_v29, 0 }
  0x5e   :  { %v111_v31 = vsel %vm110_vm0, %v109_v29, 0 }
  0x5f   :  { %v113_v32 = vand.u32 31, %v111_v31  ;;  %v112_v34 = vshrl.u32 %v111_v31, 5 }
  0x61   :  { %v114_v35 = vsub.s32 32, %v113_v32  ;;  %v116_v37 = vshll.u32 %v322_v36, %v113_v32  ;;  %v119_v39 = vshll.u32 %v323_v38, %v113_v32  ;;  %v122_v41 = vshll.u32 %v324_v40, %v113_v32 }
  0x62   :  { %v125_v43 = vshll.u32 %v325_v42, %v113_v32  ;;  %v128_v45 = vshll.u32 %v326_v44, %v113_v32  ;;  %vm131_vm1 = vcmp.lt.s32.totalorder %v112_v34, 1  ;;  %vm134_vm2 = vcmp.lt.s32.totalorder %v112_v34, 4 }
  0x63   :  { %v115_v46 = vshrl.u32 %v322_v36, %v114_v35  ;;  %v117_v47 = vshrl.u32 %v323_v38, %v114_v35  ;;  %v120_v48 = vshrl.u32 %v324_v40, %v114_v35  ;;  %v123_v49 = vshrl.u32 %v325_v42, %v114_v35 }
  0x64   :  { %v126_v50 = vshrl.u32 %v326_v44, %v114_v35  ;;  %v129_v52 = vshrl.u32 %v327_v51, %v114_v35  ;;  %vm132_vm3 = vcmp.lt.s32.totalorder %v112_v34, 2  ;;  %vm133_vm4 = vcmp.lt.s32.totalorder %v112_v34, 3 }
  0x65   :  { %v118_v54 = vor.u32 %v117_v47, %v116_v37  ;;  %v121_v55 = vor.u32 %v120_v48, %v119_v39  ;;  %v124_v56 = vor.u32 %v123_v49, %v122_v41  ;;  %v89_v35 = vmul.f32 0.6931472, %v262_v30 }
  0x66   :  { %v127_v57 = vor.u32 %v126_v50, %v125_v43  ;;  %v130_v58 = vor.u32 %v129_v52, %v128_v45 }
  0x67   :  { %v135_v59 = vsel %vm131_vm1, %v115_v46, %v118_v54  ;;  %v136_v60 = vsel %vm134_vm2, %v124_v56, 2102212464  ;;  %v139_v61 = vsel %vm131_vm1, %v118_v54, %v121_v55  ;;  %v143_v62 = vsel %vm131_vm1, %v121_v55, %v124_v56 }
  0x68   :  { %v137_v63 = vsel %vm133_vm4, %v121_v55, %v136_v60  ;;  %v140_v0 = vsel %vm134_vm2, %v127_v57, 920167782  ;;  %v144_v1 = vsel %vm134_vm2, %v130_v58, 1326507024  ;;  %v90_v40 = vmul.f32 -2.0, %v89_v35 }
  0x69   :  { %v141_v2 = vsel %vm133_vm4, %v124_v56, %v140_v0  ;;  %v145_v3 = vsel %vm133_vm4, %v127_v57, %v144_v1  ;;  %v138_v4 = vsel %vm132_vm3, %v135_v59, %v137_v63  ;;  %vm212_vm1 = vcmp.lt.f32.partialorder %v373_v23, 0.5 }
  0x6a   :  { %v142_v5 = vsel %vm132_vm3, %v139_v61, %v141_v2  ;;  %v146_v6 = vsel %vm132_vm3, %v143_v62, %v145_v3  ;;  %v154_v12 = vmul.u32 %v147_v53, %v138_v4  ;;  %263 = vrsqrt.f32 %v90_v40  ;;  %v215_v2 = vld [vmem:[#allocation3] sm:$0xff] }
  0x6b   :  { %v382_v7 = vmul.u32.u64.low %v147_v53, %v146_v6  ;;  %v383_v8 = vmul.u32.u64.high %v147_v53, %v146_v6, %v382_v7  ;;  %v385_v9 = vmul.u32.u64.low %v147_v53, %v142_v5  ;;  %v386_v10 = vmul.u32.u64.high %v147_v53, %v142_v5, %v385_v9 }
  0x6c   :  { %vm93_vm9 = vcmp.eq.f32.partialorder %v90_v40, inf  ;;  %v96_v55 = vand.u32 2147483648, %v90_v40  ;;  %vm95_vm11 = vcmp.eq.f32.partialorder %v90_v40, 0.0 }
  0x6d   :  { %vm156_vm5 = vc.u32 %v383_v8, %v385_v9  ;;  %v157_v14 = vadd.s32 1, %v386_v10  ;;  %v155_v11 = vadd.s32 %v385_v9, %v383_v8 }
  0x6f   :  { %v158_v15 = vsel %vm156_vm5, %v157_v14, %v386_v10 }
  0x70   :  { %v159_v16 = vadd.s32 %v158_v15, %v154_v12  ;;  %v220_v15 = vld [vmem:[#allocation3 + $0x8] sm:$0xff] }
  0x72   :  { %v160_v18 = vadd.s32 536870912, %v159_v16 }
  0x74   :  { %v161_v19 = vshrl.u32 %v160_v18, 30  ;;  %v264_v51 = vpop.eup %263 }
  0x75   :  { %v92_v53 = vmul.f32 %v264_v51, %v90_v40 }
  0x76   :  { %v162_v21 = vshll.u32 %v161_v19, 30  ;;  %v185_v46 = vsub.s32 4, %v161_v19 }
  0x77   :  { %v94_v57 = vsel %vm93_vm9, %v90_v40, %v92_v53 }
  0x78   :  { %v163_v22 = vsub.s32 %v159_v16, %v162_v21  ;;  %v186_v49 = vsel %vm101_vm7, %v185_v46, %v161_v19  ;;  %v97_v60 = vsel %vm95_vm11, %v96_v55, %v94_v57 }
  0x79   :  { %v188_v50 = vsel %vm100_vm8, 0, %v186_v49 }
  0x7a   :  { %v165_v25 = vsub.s32 0, %v163_v22  ;;  %v192_v52 = vand.u32 3, %v188_v50 }
  0x7c   :  { %v244_v26 = vmin.u32 %v165_v25, %v163_v22  ;;  %vm197_vm10 = vcmp.eq.s32.totalorder %v192_v52, 2  ;;  %vm194_vm12 = vcmp.eq.s32.totalorder %v192_v52, 0  ;;  %vm193_vm13 = vcmp.lt.s32.totalorder %v192_v52, 2 }
  0x7e   :  { %v167_v28 = vclz %v244_v26 }
  0x80   :  { %v245_v29 = vadd.s32 4294967294, %v167_v28 }
  0x82   :  { %vm246_vm6 = vcmp.lt.s32.totalorder %v245_v29, 0 }
  0x83   :  { %v170_v31 = vsel %vm246_vm6, 0, %v245_v29 }
  0x84   :  { %v171_v32 = vsub.s32 32, %v170_v31  ;;  %v172_v33 = vshll.u32 %v163_v22, %v170_v31  ;;  %v175_v34 = vsub.s32 4294967266, %v170_v31 }
  0x86   :  { %v173_v36 = vshrl.u32 %v155_v11, %v171_v32  ;;  %v176_v37 = vadd.s32 127, %v175_v34 }
  0x88   :  { %v174_v38 = vor.u32 %v173_v36, %v172_v33  ;;  %v177_v39 = vshll.u32 %v176_v37, 23 }
  0x8a   :  { %v178_v41 = vor.u32 4788187, %v177_v39  ;;  %v181_v42 = vcvt.s32.f32 %v174_v38 }
  0x8c   :  { %v179_v43 = vand.u32 2147483647, %v178_v41 }
  0x8e   :  { %v182_v44 = vmul.f32 %v181_v42, %v179_v43 }
  0x90   :  { %v183_v45 = vxor.u32 2147483648, %v182_v44 }
  0x92   :  { %v184_v47 = vsel %vm101_vm7, %v183_v45, %v182_v44 }
  0x93   :  { %v187_v48 = vsel %vm100_vm8, %v376_v24, %v184_v47 }
  0x94   :  { %265 = vcosq.f32 %v187_v48 }
  0x95   :  { %267 = vsinq.f32 %v187_v48 }
  0x9e   :  { %v266_v54 = vpop.eup %265 }
  0x9f   :  { %v268_v56 = vpop.eup %267  ;;  %v198_v27 = vxor.u32 2147483648, %v266_v54 }
  0xa0   :  { %v195_v58 = vxor.u32 2147483648, %v268_v56 }
  0xa1   :  { %v199_v59 = vsel %vm197_vm10, %v198_v27, %v268_v56 }
  0xa2   :  { %v196_v61 = vsel %vm194_vm12, %v266_v54, %v195_v58 }
  0xa3   :  { %v200_v62 = vsel %vm193_vm13, %v196_v61, %v199_v59 }
  0xa4   :  { %v201_v63 = vsel %vm191_vm14, nan, %v200_v62 }
  0xa5   :  { %v202_v0 = vmul.f32 %v201_v63, %v201_v63  ;;  %v216_v1 = vmul.f32 %v201_v63, %v97_v60 }
  0xa7   :  { %v203_v3 = vsub.f32 1.0, %v202_v0  ;;  %v217_v4 = vmul.f32 0.1, %v216_v1 }
  0xa9   :  { %v204_v5 = vmax.f32 %v203_v3, 0.0  ;;  %v218_v6 = vadd.f32 %v217_v4, %v215_v2 }
  0xab   :  { %219 = vst [vmem:[#allocation6] sm:$0xff] %v218_v6  ;;  %269 = vrsqrt.f32 %v204_v5  ;;  %vm207_vm15 = vcmp.eq.f32.partialorder %v204_v5, inf  ;;  %v210_v8 = vand.u32 2147483648, %v204_v5  ;;  %vm209_vm0 = vcmp.eq.f32.partialorder %v204_v5, 0.0 }
  0xb5   :  { %v270_v7 = vpop.eup %269 }
  0xb6   :  { %v206_v9 = vmul.f32 %v270_v7, %v204_v5 }
  0xb8   :  { %v208_v24 = vsel %vm207_vm15, %v204_v5, %v206_v9 }
  0xb9   :  { %v211_v10 = vsel %vm209_vm0, %v210_v8, %v208_v24 }
  0xba   :  { %v213_v12 = vsub.f32 0.0, %v211_v10 }
  0xbc   :  { %v214_v13 = vsel %vm212_vm1, %v211_v10, %v213_v12 }
  0xbd   :  { %v221_v14 = vmul.f32 %v214_v13, %v97_v60 }
  0xbf   :  { %v222_v16 = vmul.f32 0.1, %v221_v14 }
  0xc1   :  { %v223_v17 = vadd.f32 %v222_v16, %v220_v15 }
  0xc3   :  { %224 = vst [vmem:[#allocation6 + $0x8] sm:$0xff] %v223_v17 }
  0xc4   :  { %304 = shalt.err (!%p301_p12)
}
  0xc5   :  { %s305_s6 = scalar_lea.hbm %s417_s3, 256 }
  0xc6   :  { %p306_p13 = scmp.ne.s32.totalorder %s417_s3, %s305_s6  ;;  %p309_p0 = scmp.lt.u32.totalorder %s305_s6, %s417_s3 }
  0xc8   :  { %p311_p1 = pnand %p309_p0, %p306_p13 }
  0xca   :  { %314 = shalt.err (!%p311_p1)
}
  0xcb   :  { %236 = dma.vmem_to_hbm [thread:$0]  %s231_s29, 256, %s417_s3, [#allocation5], %s320_s22, %s320_s22, %s321_s23  }
  0xcc   :  { %317 = dma.done.wait [#allocation5], 256  }
  0xcd   :  { %318 = vsyncadd [#allocation5], 4294967040 }
  0xce   :  { %240 = vsyncpa [#allocation4], 1 }
  0xcf   :  { %241 = vsyncpa [#allocation5], 1 }

</bundles_post_ra>
